<compile_context>
chip_gen: v7x
topology: tpu7x:2x2x1
jax: 0.10.0
libtpu: 0.0.40
codegen_flags: <defaults>
</compile_context>

<pallas_src>
import jax
import jax.numpy as jnp
from jax.experimental import pallas as pl
from jax.experimental.pallas import tpu as pltpu


def _hw_params():
    """(target output lanes, pipeline-buffer budget bytes, vmem_limit_bytes) per TPU generation."""
    try:
        vmem_cap = int(getattr(pltpu.get_tpu_info(), "vmem_capacity_bytes", 64 * 2**20))
    except Exception:
        vmem_cap = 64 * 2**20                                  # conservative (v7x per-TC)
    try:
        kind = jax.devices()[0].device_kind.lower()
    except Exception:
        kind = ""
    is_v5e = ("v5 lite" in kind) or ("v5e" in kind) or ("v5litepod" in kind)
    target_lanes = 128 if is_v5e else 256                      # v6e/v7x MXUs are 2x256^2
    big_vmem = vmem_cap >= 100 * 2**20                         # v5e/v6e: 128 MiB, v7x: 64 MiB
    budget = (20 if big_vmem else 8) * 2**20                   # activation+output buffer budget
    vmem_limit = min(100 * 2**20, (vmem_cap * 3) // 4)         # headroom under physical VMEM
    return target_lanes, budget, vmem_limit


def transition_kernel(x_ref, scale_ref, shift_ref, w_ref, o_ref):
    # BN (folded to f32 scale/shift) + ReLU, then ONE bf16 MXU matmul (f32 accumulation) that
    # simultaneously performs the 1x1 conv, the quadrant sum (AvgPool folded into the weight)
    # and the block-diagonal routing to lane-dense output columns.
    x = x_ref[...].astype(jnp.float32)                                   # (rows, G*4*C_in)
    m = jnp.maximum(x * scale_ref[...] + shift_ref[...], 0.0)
    o_ref[...] = jnp.dot(m.astype(w_ref.dtype), w_ref[...],
                         preferred_element_type=jnp.float32).astype(o_ref.dtype)


def transition_layer(x_nchw, gamma, beta, run_mean, run_var, conv_w, *,
                     eps=1e-5, compute_dtype=jnp.bfloat16, channels_last_output=False):
    """x_nchw: (N, C_in, H, W).  conv_w: (C_out, C_in, 1, 1).
    Returns (N, C_out, H//2, W//2), or (N, H//2, W//2, C_out) if channels_last_output."""
    N, C_in, H, W = x_nchw.shape
    C_out = conv_w.shape[0]
    assert H % 2 == 0 and W % 2 == 0, "H and W must be even (AvgPool2d(2,2))"
    Ho, Wo = H // 2, W // 2
    M = N * Ho * Wo                                            # output spatial positions

    target_lanes, budget, vmem_limit = _hw_params()

    # Position-packing factor: pack G consecutive output positions on the lane axis so the
    # output tile fills the MXU's N dimension (256 lanes on v6e/v7x, 128 on v5e).
    if C_out < target_lanes and target_lanes % C_out == 0:
        G = target_lanes // C_out
        while G > 1 and M % G != 0:
            G //= 2
    else:
        G = 1
    P = M // G
    Gin, Gout = G * 4 * C_in, G * C_out
    in_bytes = jnp.dtype(compute_dtype).itemsize
    out_bytes = jnp.dtype(compute_dtype).itemsize

    # ---- glue: ONE transpose pass; everything else is a free reshape / tiny param prep ------
    xq = x_nchw.astype(compute_dtype)                          # bf16 storage (bandwidth win)
    x_packed = jnp.transpose(xq.reshape(N, C_in, Ho, 2, Wo, 2),
                             (0, 2, 4, 3, 5, 1)).reshape(P, Gin)

    # BN folded to per-channel scale/shift (kept f32), tiled to the packed lane layout.
    inv_std = 1.0 / jnp.sqrt(run_var.astype(jnp.float32) + eps)
    scale_c = gamma.astype(jnp.float32) * inv_std
    shift_c = beta.astype(jnp.float32) - run_mean.astype(jnp.float32) * scale_c
    scale = jnp.tile(scale_c, 4 * G).reshape(1, Gin)
    shift = jnp.tile(shift_c, 4 * G).reshape(1, Gin)

    # AvgPool folded through the (linear) 1x1 conv: 0.25 into the weight, 4 quadrants stacked
    # on K, block-diagonal over the G packed positions.  Stored bf16 for the MXU.
    w_base = conv_w.reshape(C_out, C_in).T.astype(jnp.float32) * 0.25    # (C_in, C_out)
    w_quad = jnp.tile(w_base, (4, 1))                                    # (4*C_in, C_out)
    w_bd = jnp.kron(jnp.eye(G, dtype=jnp.float32), w_quad).astype(compute_dtype)  # (Gin, Gout)

    # ---- tile sizing: biggest row tile within the generation-aware VMEM budget ---------------
    n_in_buf = 3                                               # Buffered(3) activation stream
    per_row = n_in_buf * Gin * in_bytes + 2 * Gout * out_bytes
    fixed = 2 * Gin * Gout * in_bytes + 4 * Gin * 4            # weight + scale/shift buffers
    rows_max = max(8, min(2048, (budget - fixed) // per_row if budget > fixed else 8))

    if P <= rows_max:
        rows = P                                               # single block (== full dim, OK)
    else:
        rows_base = (rows_max // 8) * 8
        rows = 0
        for r in range(rows_base, max(8, rows_base // 2) - 1, -8):   # prefer an exact divisor
            if P % r == 0:
                rows = r
                break
        if rows == 0:
            rows = rows_base            # ragged last tile: Pallas drops OOB writes (no pad copy)
    grid_steps = (P + rows - 1) // rows

    x_spec = (pl.BlockSpec((rows, Gin), lambda i: (i, 0), pipeline_mode=pl.Buffered(3))
              if grid_steps >= 3 else pl.BlockSpec((rows, Gin), lambda i: (i, 0)))

    out = pl.pallas_call(
        transition_kernel,
        out_shape=jax.ShapeDtypeStruct((P, Gout), compute_dtype),
        grid=(grid_steps,),
        in_specs=[x_spec,
                  pl.BlockSpec((1, Gin), lambda i: (0, 0)),
                  pl.BlockSpec((1, Gin), lambda i: (0, 0)),
                  pl.BlockSpec((Gin, Gout), lambda i: (0, 0))],
        out_specs=pl.BlockSpec((rows, Gout), lambda i: (i, 0)),
        compiler_params=pltpu.CompilerParams(
            dimension_semantics=("parallel",),                 # megacore / v7x 2-TC sharding
            vmem_limit_bytes=vmem_limit),
    )(x_packed, scale, shift, w_bd)

    out = out.reshape(N, Ho, Wo, C_out)
    if channels_last_output:
        return out                                             # preferred inside NHWC models
    return jnp.transpose(out, (0, 3, 1, 2))                    # NCHW, matches the PyTorch module


def _reference(x_nchw, gamma, beta, run_mean, run_var, conv_w, eps=1e-5):
    # pure-JAX f32 reference matching the PyTorch module in eval mode (act_fn = ReLU)
    xn = (x_nchw - run_mean[None, :, None, None]) / jnp.sqrt(run_var + eps)[None, :, None, None]
    xn = xn * gamma[None, :, None, None] + beta[None, :, None, None]
    xn = jnp.maximum(xn, 0.0)
    y = jnp.einsum('nchw,oc->nohw', xn, conv_w.reshape(conv_w.shape[0], conv_w.shape[1]))
    Nn, Co, Hh, Ww = y.shape
    return y.reshape(Nn, Co, Hh // 2, 2, Ww // 2, 2).mean(axis=(3, 5))


if __name__ == "__main__":
    key = jax.random.PRNGKey(0)
    N, C_in, C_out, H, W = 2, 16, 8, 16, 16

    k = jax.random.split(key, 6)
    x = jax.random.normal(k[0], (N, C_in, H, W), dtype=jnp.float32)
    gamma = jax.random.normal(k[1], (C_in,), dtype=jnp.float32) * 0.1 + 1.0
    beta = jax.random.normal(k[2], (C_in,), dtype=jnp.float32) * 0.1
    run_mean = jax.random.normal(k[3], (C_in,), dtype=jnp.float32) * 0.1
    run_var = jax.random.uniform(k[4], (C_in,), dtype=jnp.float32, minval=0.5, maxval=1.5)
    conv_w = jax.random.normal(k[5], (C_out, C_in, 1, 1), dtype=jnp.float32) * 0.1

    out = jax.block_until_ready(
        transition_layer(x, gamma, beta, run_mean, run_var, conv_w))

    # The kernel path intentionally keeps activations/weights/output in bf16 (the op is
    # HBM-bandwidth bound) with f32 accumulation; compare against the f32 reference evaluated
    # on the same bf16-quantized input with a tolerance covering bf16 operand/output rounding.
    x_q = x.astype(jnp.bfloat16).astype(jnp.float32)
    ref = _reference(x_q, gamma, beta, run_mean, run_var, conv_w)

    assert out.shape == (N, C_out, H // 2, W // 2)
    out_f32 = out.astype(jnp.float32)
    err = float(jnp.max(jnp.abs(out_f32 - ref)))
    assert jnp.allclose(out_f32, ref, atol=2e-2, rtol=2e-2), err

    print("KERNEL_OK")
</pallas_src>

<mosaic_0001>
module attributes {stable_mosaic.version = 11 : i64} {
  func.func @transition_kernel(%arg0: i32, %arg1: memref<4x2048xbf16, #tpu.memory_space<vmem>>, %arg2: memref<1x2048xf32, #tpu.memory_space<vmem>>, %arg3: memref<1x2048xf32, #tpu.memory_space<vmem>>, %arg4: memref<2048x256xbf16, #tpu.memory_space<vmem>>, %arg5: memref<4x256xbf16, #tpu.memory_space<vmem>>) attributes {dimension_semantics = [#tpu.dimension_semantics<parallel>], iteration_bounds = array<i64: 1>, scalar_prefetch = 0 : i64, scratch_operands = 0 : i64, tpu.core_type = #tpu.core_type<tc>, window_params = [{transform_indices = @transform_0, window_bounds = array<i64: 4, 2048>}, {pipeline_mode = #tpu.pipeline_mode<synchronous>, transform_indices = @transform_1, window_bounds = array<i64: 1, 2048>}, {pipeline_mode = #tpu.pipeline_mode<synchronous>, transform_indices = @transform_2, window_bounds = array<i64: 1, 2048>}, {pipeline_mode = #tpu.pipeline_mode<synchronous>, transform_indices = @transform_3, window_bounds = array<i64: 2048, 256>}, {transform_indices = @transform_4, window_bounds = array<i64: 4, 256>}]} {
    %c0 = arith.constant 0 : index
    %c0_0 = arith.constant 0 : index
    %0 = vector.load %arg1[%c0, %c0_0] : memref<4x2048xbf16, #tpu.memory_space<vmem>>, vector<4x2048xbf16>
    %1 = arith.extf %0 : vector<4x2048xbf16> to vector<4x2048xf32>
    %c0_1 = arith.constant 0 : index
    %c0_2 = arith.constant 0 : index
    %2 = vector.load %arg2[%c0_1, %c0_2] : memref<1x2048xf32, #tpu.memory_space<vmem>>, vector<1x2048xf32>
    %3 = vector.broadcast %2 : vector<1x2048xf32> to vector<4x2048xf32>
    %4 = arith.mulf %1, %3 : vector<4x2048xf32>
    %c0_3 = arith.constant 0 : index
    %c0_4 = arith.constant 0 : index
    %5 = vector.load %arg3[%c0_3, %c0_4] : memref<1x2048xf32, #tpu.memory_space<vmem>>, vector<1x2048xf32>
    %6 = vector.broadcast %5 : vector<1x2048xf32> to vector<4x2048xf32>
    %7 = arith.addf %4, %6 : vector<4x2048xf32>
    %cst = arith.constant 0.000000e+00 : f32
    %8 = vector.broadcast %cst : f32 to vector<4x2048xf32>
    %9 = arith.maximumf %7, %8 : vector<4x2048xf32>
    %10 = arith.truncf %9 : vector<4x2048xf32> to vector<4x2048xbf16>
    %c0_5 = arith.constant 0 : index
    %c0_6 = arith.constant 0 : index
    %11 = vector.load %arg4[%c0_5, %c0_6] : memref<2048x256xbf16, #tpu.memory_space<vmem>>, vector<2048x256xbf16>
    %cst_7 = arith.constant dense<0.000000e+00> : vector<4x256xf32>
    %12 = tpu.matmul %10, %11, %cst_7 {dimension_numbers = #tpu.dot_dimension_numbers<[1], [0], [0], [1], [0, 0, 1, 1], [], []>} : vector<4x2048xbf16>, vector<2048x256xbf16>, vector<4x256xf32> -> vector<4x256xf32>
    %13 = arith.truncf %12 : vector<4x256xf32> to vector<4x256xbf16>
    %c0_8 = arith.constant 0 : index
    %c0_9 = arith.constant 0 : index
    %14 = vector.load %arg5[%c0_8, %c0_9] : memref<4x256xbf16, #tpu.memory_space<vmem>>, vector<4x256xbf16>
    tpu.vector_store %arg5[%c0_8, %c0_9], %13 {strides = array<i32>} : memref<4x256xbf16, #tpu.memory_space<vmem>>, vector<4x256xbf16>,
    return
  }
  func.func @transform_0(%arg0: i32) -> (i32, i32) {
    %c0_i32 = arith.constant 0 : i32
    %c0_i32_0 = arith.constant 0 : i32
    return %arg0, %c0_i32 : i32, i32
  }
  func.func @transform_1(%arg0: i32) -> (i32, i32) {
    %c0_i32 = arith.constant 0 : i32
    %c0_i32_0 = arith.constant 0 : i32
    %c0_i32_1 = arith.constant 0 : i32
    return %c0_i32, %c0_i32_0 : i32, i32
  }
  func.func @transform_2(%arg0: i32) -> (i32, i32) {
    %c0_i32 = arith.constant 0 : i32
    %c0_i32_0 = arith.constant 0 : i32
    %c0_i32_1 = arith.constant 0 : i32
    return %c0_i32, %c0_i32_0 : i32, i32
  }
  func.func @transform_3(%arg0: i32) -> (i32, i32) {
    %c0_i32 = arith.constant 0 : i32
    %c0_i32_0 = arith.constant 0 : i32
    %c0_i32_1 = arith.constant 0 : i32
    return %c0_i32, %c0_i32_0 : i32, i32
  }
  func.func @transform_4(%arg0: i32) -> (i32, i32) {
    %c0_i32 = arith.constant 0 : i32
    %c0_i32_0 = arith.constant 0 : i32
    return %arg0, %c0_i32 : i32, i32
  }
}

</mosaic_0001>

<bundles_post_ra>
// kernel: tpu_custom_call.1
= control target key start
LH: loop header
LB: loop body
LE: loop exit
PB: predicated region body
PF: predicated region fallthrough
CT: control target
= control target key end

     0   :  { %9 = vsyncpa [#allocation3], 0  ;;  %s3200_s0 = inlined_call_operand.hbm [shape: bf16[4,2048], index: 0, kind: input, shape index: {}]   ;;  %s3201_s1 = inlined_call_operand.hbm [shape: f32[1,2048], index: 1, kind: input, shape index: {}]   ;;  %s3202_s2 = inlined_call_operand.hbm [shape: f32[1,2048], index: 2, kind: input, shape index: {}]   ;;  %s3203_s3 = inlined_call_operand.hbm [shape: bf16[2048,256], index: 3, kind: input, shape index: {}]   ;;  %s3204_s4 = inlined_call_operand.hbm [shape: bf16[4,256], index: 4, kind: output, shape index: {}]  }
   0x1   :  { %10 = vsyncpa [#allocation6], 0 }
   0x2   :  { %11 = vsyncpa [#allocation9], 0 }
   0x3   :  { %12 = vsyncpa [#allocation4], 0  ;;  %s3003_s15 = smov [#allocation5]   ;;  %s3004_s17 = smov [#allocation2]  }
   0x4   :  { %s29_s16 = sshll.u32 %s3003_s15, 4  ;;  %s19_s18 = sshll.u32 %s3004_s17, 4  ;;  %s30_s16 = int_to_ptr.vmem [resolvable:$true] %s29_s16  ;;  %s20_s18 = int_to_ptr.vmem [resolvable:$true] %s19_s18 }
   0x5   :  { %s2885_s21 = scalar_lea.hbm %s3201_s1, 256 }
   0x6   :  { %p2886_p0 = scmp.ne.s32.totalorder %s3201_s1, %s2885_s21  ;;  %p2889_p1 = scmp.lt.u32.totalorder %s2885_s21, %s3201_s1 }
   0x8   :  { %p2891_p2 = pnand %p2889_p1, %p2886_p0 }
   0xa   :  { %2894 = shalt.err (!%p2891_p2)
}
   0xb   :  { %s2895_s26 = scalar_lea.vmem %s30_s16, 256  ;;  %p2900_p4 = scmp.lt.s32.totalorder %s30_s16, %s30_s16 }
   0xc   :  { %p2896_p3 = scmp.ne.s32.totalorder %s30_s16, %s2895_s26  ;;  %p2901_p5 = scmp.lt.s32.totalorder %s2895_s26, %s2895_s26 }
   0xe   :  { %p2902_p6 = por %p2901_p5, %p2900_p4 }
  0x10   :  { %p2903_p7 = pnand %p2902_p6, %p2896_p3 }
  0x12   :  { %2906 = shalt.err (!%p2903_p7)
}
  0x13   :  { %32 = dma.hbm_to_vmem [thread:$0]  %s3201_s1, 256, %s30_s16, [#allocation6]  }
  0x14   :  { %s2907_s5 = scalar_lea.hbm %s3200_s0, 512 }
  0x15   :  { %p2908_p8 = scmp.ne.s32.totalorder %s3200_s0, %s2907_s5  ;;  %p2911_p9 = scmp.lt.u32.totalorder %s2907_s5, %s3200_s0 }
  0x17   :  { %p2913_p10 = pnand %p2911_p9, %p2908_p8 }
  0x19   :  { %2916 = shalt.err (!%p2913_p10)
}
  0x1a   :  { %s2917_s10 = scalar_lea.vmem %s20_s18, 512  ;;  %p2922_p12 = scmp.lt.s32.totalorder %s20_s18, %s20_s18 }
  0x1b   :  { %p2918_p11 = scmp.ne.s32.totalorder %s20_s18, %s2917_s10  ;;  %p2923_p13 = scmp.lt.s32.totalorder %s2917_s10, %s2917_s10 }
  0x1d   :  { %p2924_p0 = por %p2923_p13, %p2922_p12 }
  0x1f   :  { %p2925_p1 = pnand %p2924_p0, %p2918_p11 }
  0x21   :  { %2928 = shalt.err (!%p2925_p1)
}
  0x22   :  { %22 = dma.hbm_to_vmem [thread:$0]  %s3200_s0, 512, %s20_s18, [#allocation3]  }
  0x23   :  { %s3005_s12 = smov [#allocation7]   ;;  %s3006_s14 = smov [#allocation8]  }
  0x24   :  { %s39_s13 = sshll.u32 %s3005_s12, 4  ;;  %s48_s15 = sshll.u32 %s3006_s14, 4  ;;  %s40_s13 = int_to_ptr.vmem [resolvable:$true] %s39_s13  ;;  %s3059_s15 = int_to_ptr.vmem [resolvable:$true] %s48_s15 }
  0x25   :  { %s2929_s19 = scalar_lea.hbm %s3202_s2, 256 }
  0x26   :  { %p2930_p2 = scmp.ne.s32.totalorder %s3202_s2, %s2929_s19  ;;  %p2933_p3 = scmp.lt.u32.totalorder %s2929_s19, %s3202_s2 }
  0x28   :  { %p2935_p4 = pnand %p2933_p3, %p2930_p2 }
  0x2a   :  { %2938 = shalt.err (!%p2935_p4)
}
  0x2b   :  { %s2939_s0 = scalar_lea.vmem %s40_s13, 256  ;;  %p2944_p6 = scmp.lt.s32.totalorder %s40_s13, %s40_s13 }
  0x2c   :  { %p2940_p5 = scmp.ne.s32.totalorder %s40_s13, %s2939_s0  ;;  %p2945_p7 = scmp.lt.s32.totalorder %s2939_s0, %s2939_s0 }
  0x2e   :  { %p2946_p8 = por %p2945_p7, %p2944_p6 }
  0x30   :  { %p2947_p9 = pnand %p2946_p8, %p2940_p5 }
  0x32   :  { %2950 = shalt.err (!%p2947_p9)
}
  0x33   :  { %42 = dma.hbm_to_vmem [thread:$0]  %s3202_s2, 256, %s40_s13, [#allocation6]  }
  0x34   :  { %s2951_s27 = scalar_lea.hbm %s3203_s3, 32768 }
  0x35   :  { %p2952_p10 = scmp.ne.s32.totalorder %s3203_s3, %s2951_s27  ;;  %p2955_p11 = scmp.lt.u32.totalorder %s2951_s27, %s3203_s3 }
  0x37   :  { %p2957_p12 = pnand %p2955_p11, %p2952_p10 }
  0x39   :  { %2960 = shalt.err (!%p2957_p12)
}
  0x3a   :  { %s2961_s6 = scalar_lea.vmem %s3059_s15, 32768  ;;  %p2966_p0 = scmp.lt.s32.totalorder %s3059_s15, %s3059_s15 }
  0x3b   :  { %p2962_p13 = scmp.ne.s32.totalorder %s3059_s15, %s2961_s6  ;;  %p2967_p1 = scmp.lt.s32.totalorder %s2961_s6, %s2961_s6 }
  0x3d   :  { %p2968_p2 = por %p2967_p1, %p2966_p0 }
  0x3f   :  { %p2969_p3 = pnand %p2968_p2, %p2962_p13 }
  0x41   :  { %2972 = shalt.err (!%p2969_p3)
}
  0x42   :  { %s3007_s2 = smov 128   ;;  %s3008_s7 = smov 8  }
  0x43   :  { %54 = dma.hbm_to_vmem [thread:$0]  %s3203_s3, 32768, %s3059_s15, [#allocation9], %s3007_s2, %s3007_s2, %s3008_s7  }
  0x44   :  { %2995 = dma.done.wait [#allocation3], 512  }
  0x45   :  { %2996 = vsyncadd [#allocation3], 4294966784 }
  0x46   :  { %2997 = dma.done.wait [#allocation6], 512  }
  0x47   :  { %2998 = vsyncadd [#allocation6], 4294966784 }
  0x48   :  { %2999 = dma.done.wait [#allocation9], 32768  }
  0x49   :  { %3000 = vsyncadd [#allocation9], 4294934528  ;;  %v2497_v0 = vld [vmem:[#allocation8 + $0x4] ss:$8 sps:$4 sm:$0xff]   ;;  %v2501_v2 = vld [vmem:[#allocation8] ss:$8 sps:$4 sm:$0xff]   ;;  %v83_v37 = vlaneseq }
  0x4a   :  { %v2499_v1 = vld [vmem:[#allocation8 + $0x404] ss:$8 sps:$4 sm:$0xff]   ;;  %1847 = vmatprep.subr.bf16.mxu1 %v2497_v0  ;;  %v2502_v3 = vld [vmem:[#allocation8 + $0x400] ss:$8 sps:$4 sm:$0xff]   ;;  %v2503_v4 = vld [vmem:[#allocation8 + $0x14] ss:$8 sps:$4 sm:$0xff]  }
  0x4b   :  { %2011 = vmatprep.subr.bf16.mxu0 %v2499_v1  ;;  %1848 = vmatpush1.bf16.msra.mxu1 %v2501_v2  ;;  %v2505_v5 = vld [vmem:[#allocation8 + $0x414] ss:$8 sps:$4 sm:$0xff]   ;;  %v2507_v6 = vld [vmem:[#allocation8 + $0x10] ss:$8 sps:$4 sm:$0xff]   ;;  %v2509_v8 = vld [vmem:[#allocation8 + $0x24] ss:$8 sps:$4 sm:$0xff]  }
  0x4c   :  { %2012 = vmatpush1.bf16.msra.mxu0 %v2502_v3  ;;  %1849 = vmatprep.subr.bf16.mxu1 %v2503_v4  ;;  %v2508_v7 = vld [vmem:[#allocation8 + $0x410] ss:$8 sps:$4 sm:$0xff]   ;;  %v2511_v9 = vld [vmem:[#allocation8 + $0x424] ss:$8 sps:$4 sm:$0xff]   ;;  %v2513_v10 = vld [vmem:[#allocation8 + $0x20] ss:$8 sps:$4 sm:$0xff]  }
  0x4d   :  { %2013 = vmatprep.subr.bf16.mxu0 %v2505_v5  ;;  %v2514_v11 = vld [vmem:[#allocation8 + $0x420] ss:$8 sps:$4 sm:$0xff]   ;;  %v2515_v12 = vld [vmem:[#allocation8 + $0x34] ss:$8 sps:$4 sm:$0xff]   ;;  %v2519_v14 = vld [vmem:[#allocation8 + $0x30] ss:$8 sps:$4 sm:$0xff]  }
  0x4e   :  { %v2517_v13 = vld [vmem:[#allocation8 + $0x434] ss:$8 sps:$4 sm:$0xff]   ;;  %v2520_v15 = vld [vmem:[#allocation8 + $0x430] ss:$8 sps:$4 sm:$0xff]   ;;  %v2521_v16 = vld [vmem:[#allocation8 + $0x44] ss:$8 sps:$4 sm:$0xff]  }
  0x4f   :  { %1850 = vmatpush1.bf16.msra.mxu1 %v2507_v6  ;;  %v2523_v17 = vld [vmem:[#allocation8 + $0x444] ss:$8 sps:$4 sm:$0xff]   ;;  %v2525_v18 = vld [vmem:[#allocation8 + $0x40] ss:$8 sps:$4 sm:$0xff]   ;;  %v2527_v20 = vld [vmem:[#allocation8 + $0x54] ss:$8 sps:$4 sm:$0xff]  }
  0x50   :  { %2014 = vmatpush1.bf16.msra.mxu0 %v2508_v7  ;;  %1851 = vmatprep.subr.bf16.mxu1 %v2509_v8  ;;  %v2526_v19 = vld [vmem:[#allocation8 + $0x440] ss:$8 sps:$4 sm:$0xff]   ;;  %v2529_v21 = vld [vmem:[#allocation8 + $0x454] ss:$8 sps:$4 sm:$0xff]   ;;  %v2531_v22 = vld [vmem:[#allocation8 + $0x50] ss:$8 sps:$4 sm:$0xff]  }
  0x51   :  { %2015 = vmatprep.subr.bf16.mxu0 %v2511_v9  ;;  %v2532_v23 = vld [vmem:[#allocation8 + $0x450] ss:$8 sps:$4 sm:$0xff]   ;;  %v2533_v24 = vld [vmem:[#allocation8 + $0x64] ss:$8 sps:$4 sm:$0xff]   ;;  %v2537_v26 = vld [vmem:[#allocation8 + $0x60] ss:$8 sps:$4 sm:$0xff]  }
  0x52   :  { %v2535_v25 = vld [vmem:[#allocation8 + $0x464] ss:$8 sps:$4 sm:$0xff]   ;;  %v2538_v27 = vld [vmem:[#allocation8 + $0x460] ss:$8 sps:$4 sm:$0xff]   ;;  %v2539_v28 = vld [vmem:[#allocation8 + $0x74] ss:$8 sps:$4 sm:$0xff]  }
  0x53   :  { %1852 = vmatpush1.bf16.msra.mxu1 %v2513_v10  ;;  %v2541_v29 = vld [vmem:[#allocation8 + $0x474] ss:$8 sps:$4 sm:$0xff]   ;;  %v2543_v30 = vld [vmem:[#allocation8 + $0x70] ss:$8 sps:$4 sm:$0xff]   ;;  %v2545_v32 = vld [vmem:[#allocation8 + $0x84] ss:$8 sps:$4 sm:$0xff]  }
  0x54   :  { %2016 = vmatpush1.bf16.msra.mxu0 %v2514_v11  ;;  %1853 = vmatprep.subr.bf16.mxu1 %v2515_v12  ;;  %v2544_v31 = vld [vmem:[#allocation8 + $0x470] ss:$8 sps:$4 sm:$0xff]   ;;  %v2547_v33 = vld [vmem:[#allocation8 + $0x484] ss:$8 sps:$4 sm:$0xff]   ;;  %v2549_v34 = vld [vmem:[#allocation8 + $0x80] ss:$8 sps:$4 sm:$0xff]  }
  0x55   :  { %2017 = vmatprep.subr.bf16.mxu0 %v2517_v13  ;;  %v2550_v35 = vld [vmem:[#allocation8 + $0x480] ss:$8 sps:$4 sm:$0xff]   ;;  %v2551_v36 = vld [vmem:[#allocation8 + $0x94] ss:$8 sps:$4 sm:$0xff]   ;;  %v2555_v39 = vld [vmem:[#allocation8 + $0x90] ss:$8 sps:$4 sm:$0xff]  }
  0x56   :  { %v2553_v38 = vld [vmem:[#allocation8 + $0x494] ss:$8 sps:$4 sm:$0xff]   ;;  %v2556_v40 = vld [vmem:[#allocation8 + $0x490] ss:$8 sps:$4 sm:$0xff]   ;;  %v2557_v41 = vld [vmem:[#allocation8 + $0xa4] ss:$8 sps:$4 sm:$0xff]  }
  0x57   :  { %1854 = vmatpush1.bf16.msra.mxu1 %v2519_v14  ;;  %v3090_v42 = vshrl.u32 %v83_v37, 7  ;;  %v2559_v43 = vld [vmem:[#allocation8 + $0x4a4] ss:$8 sps:$4 sm:$0xff]   ;;  %v2561_v44 = vld [vmem:[#allocation8 + $0xa0] ss:$8 sps:$4 sm:$0xff]   ;;  %v3102_v56 = vld [vmem:[#allocation7] sm:$0xff] }
  0x58   :  { %2018 = vmatpush1.bf16.msra.mxu0 %v2520_v15  ;;  %1855 = vmatprep.subr.bf16.mxu1 %v2521_v16  ;;  %v2562_v45 = vld [vmem:[#allocation8 + $0x4a0] ss:$8 sps:$4 sm:$0xff]   ;;  %v2563_v46 = vld [vmem:[#allocation8 + $0xb4] ss:$8 sps:$4 sm:$0xff]   ;;  %v2567_v52 = vld [vmem:[#allocation8 + $0xb0] ss:$8 sps:$4 sm:$0xff]  }
  0x59   :  { %2019 = vmatprep.subr.bf16.mxu0 %v2523_v17  ;;  %v85_v47 = vsub.s32 0, %v3090_v42  ;;  %v89_v48 = vsub.s32 1, %v3090_v42  ;;  %v2565_v49 = vld [vmem:[#allocation8 + $0x4b4] ss:$8 sps:$4 sm:$0xff]   ;;  %v3095_v50 = vsub.s32 2, %v3090_v42  ;;  %v3098_v51 = vsub.s32 3, %v3090_v42 }
  0x5a   :  { %v2568_v53 = vld [vmem:[#allocation8 + $0x4b0] ss:$8 sps:$4 sm:$0xff]   ;;  %v67_v54 = vld [vmem:[#allocation2] sm:$0xff]  ;;  %v3108_v1 = vld [vmem:[#allocation5 + $0x8] sm:$0xff]  ;;  %s3009_s3 = smov [#allocation10]  }
  0x5b   :  { %1856 = vmatpush1.bf16.msra.mxu1 %v2525_v18  ;;  %v3100_v55 = vld [vmem:[#allocation5] sm:$0xff]  ;;  %v71_v59 = vunpack.c.l.bf16 %v67_v54  ;;  %v178_v62 = vrot.slane %v3102_v56, %v85_v47  ;;  %v182_v63 = vrot.slane %v3102_v56, %v89_v48  ;;  %v69_v0 = vld [vmem:[#allocation2 + $0x10] sm:$0xff]  ;;  %v3110_v2 = vld [vmem:[#allocation7 + $0x8] sm:$0xff]  ;;  %v72_v5 = vunpack.c.h.bf16 %v67_v54  ;;  %s2195_s10 = sshll.u32 %s3009_s3, 4  ;;  %s2196_s10 = int_to_ptr.vmem [resolvable:$true] %s2195_s10 }
  0x5c   :  { %2020 = vmatpush1.bf16.msra.mxu0 %v2526_v19  ;;  %1857 = vmatprep.subr.bf16.mxu1 %v2527_v20  ;;  %v2569_v57 = vld [vmem:[#allocation8 + $0xc4] ss:$8 sps:$4 sm:$0xff]   ;;  %v86_v60 = vrot.slane %v3100_v55, %v85_v47  ;;  %v90_v61 = vrot.slane %v3100_v55, %v89_v48  ;;  %v94_v3 = vrot.slane %v3100_v55, %v3095_v50  ;;  %v75_v7 = vunpack.c.l.bf16 %v69_v0  ;;  %v2573_v13 = vld [vmem:[#allocation8 + $0xc0] ss:$8 sps:$4 sm:$0xff]   ;;  %v2575_v18 = vld [vmem:[#allocation8 + $0xd4] ss:$8 sps:$4 sm:$0xff]   ;;  %p2978_p5 = scmp.lt.s32.totalorder %s2196_s10, %s2196_s10 }
  0x5d   :  { %2021 = vmatprep.subr.bf16.mxu0 %v2529_v21  ;;  %v2571_v58 = vld [vmem:[#allocation8 + $0x4c4] ss:$8 sps:$4 sm:$0xff]   ;;  %v98_v4 = vrot.slane %v3100_v55, %v3098_v51  ;;  %v118_v8 = vrot.slane %v3108_v1, %v85_v47  ;;  %v239_v9 = vcombine.low %v178_v62, %v182_v63  ;;  %v122_v10 = vrot.slane %v3108_v1, %v89_v48  ;;  %v2574_v14 = vld [vmem:[#allocation8 + $0x4c0] ss:$8 sps:$4 sm:$0xff]   ;;  %v2577_v19 = vld [vmem:[#allocation8 + $0x4d4] ss:$8 sps:$4 sm:$0xff]  }
  0x5e   :  { %v147_v6 = vcombine.low %v86_v60, %v90_v61  ;;  %v210_v11 = vrot.slane %v3110_v2, %v85_v47  ;;  %v214_v12 = vrot.slane %v3110_v2, %v89_v48  ;;  %v186_v17 = vrot.slane %v3102_v56, %v3095_v50  ;;  %v2583_v37 = vld [vmem:[#allocation8 + $0x4e4] ss:$8 sps:$4 sm:$0xff]   ;;  %s2973_s1 = scalar_lea.vmem %s2196_s10, 64 }
  0x5f   :  { %1858 = vmatpush1.bf16.msra.mxu1 %v2531_v22  ;;  %v148_v16 = vcombine.low %v94_v3, %v98_v4  ;;  %v76_v20 = vunpack.c.h.bf16 %v69_v0  ;;  %v151_v21 = vcombine.low %v118_v8, %v122_v10  ;;  %v2598_v60 = vld [vmem:[#allocation8 + $0x504] ss:$8 sps:$4 sm:$0xff]   ;;  %v2593_v3 = vld [vmem:[#allocation8 + $0x100] ss:$8 sps:$4 sm:$0xff]   ;;  %v2602_v10 = vld [vmem:[#allocation8 + $0x510] ss:$8 sps:$4 sm:$0xff]   ;;  %p2974_p4 = scmp.ne.s32.totalorder %s2196_s10, %s2973_s1  ;;  %p2979_p6 = scmp.lt.s32.totalorder %s2973_s1, %s2973_s1 }
  0x60   :  { %2022 = vmatpush1.bf16.msra.mxu0 %v2532_v23  ;;  %1859 = vmatprep.subr.bf16.mxu1 %v2533_v24  ;;  %v163_v15 = vmul.f32 %v147_v6, %v71_v59  ;;  %v243_v22 = vcombine.low %v210_v11, %v214_v12  ;;  %v190_v23 = vrot.slane %v3102_v56, %v3098_v51  ;;  %v2595_v59 = vld [vmem:[#allocation8 + $0x104] ss:$8 sps:$4 sm:$0xff]   ;;  %v2596_v4 = vld [vmem:[#allocation8 + $0x500] ss:$8 sps:$4 sm:$0xff]   ;;  %v2604_v6 = vld [vmem:[#allocation8 + $0x514] ss:$8 sps:$4 sm:$0xff]  }
  0x61   :  { %2023 = vmatprep.subr.bf16.mxu0 %v2535_v25  ;;  %v164_v25 = vmul.f32 %v148_v16, %v72_v5  ;;  %v2601_v5 = vld [vmem:[#allocation8 + $0x114] ss:$8 sps:$4 sm:$0xff]   ;;  %v2607_v11 = vld [vmem:[#allocation8 + $0x124] ss:$8 sps:$4 sm:$0xff]   ;;  %p2980_p7 = por %p2979_p6, %p2978_p5 }
  0x62   :  { %v255_v24 = vadd.f32 %v239_v9, %v163_v15  ;;  %v2599_v9 = vld [vmem:[#allocation8 + $0x110] ss:$8 sps:$4 sm:$0xff]   ;;  %v2610_v12 = vld [vmem:[#allocation8 + $0x524] ss:$8 sps:$4 sm:$0xff]   ;;  %v2613_v15 = vld [vmem:[#allocation8 + $0x134] ss:$8 sps:$4 sm:$0xff]  }
  0x63   :  { %1860 = vmatpush1.bf16.msra.mxu1 %v2537_v26  ;;  %v126_v26 = vrot.slane %v3108_v1, %v3095_v50  ;;  %v2616_v16 = vld [vmem:[#allocation8 + $0x534] ss:$8 sps:$4 sm:$0xff]   ;;  %p2981_p8 = pnand %p2980_p7, %p2974_p4 }
  0x64   :  { %2024 = vmatpush1.bf16.msra.mxu0 %v2538_v27  ;;  %1861 = vmatprep.subr.bf16.mxu1 %v2539_v28  ;;  %v130_v27 = vrot.slane %v3108_v1, %v3098_v51  ;;  %v167_v28 = vmul.f32 %v151_v21, %v75_v7  ;;  %v2617_v21 = vld [vmem:[#allocation8 + $0x140] ss:$8 sps:$4 sm:$0xff]  }
  0x65   :  { %2025 = vmatprep.subr.bf16.mxu0 %v2541_v29  ;;  %v240_v29 = vcombine.low %v186_v17, %v190_v23  ;;  %v2611_v17 = vld [vmem:[#allocation8 + $0x130] ss:$8 sps:$4 sm:$0xff]   ;;  %v2625_v23 = vld [vmem:[#allocation8 + $0x154] ss:$8 sps:$4 sm:$0xff]  }
  0x67   :  { %1862 = vmatpush1.bf16.msra.mxu1 %v2543_v30  ;;  %v218_v30 = vrot.slane %v3110_v2, %v3095_v50  ;;  %v2589_v50 = vld [vmem:[#allocation8 + $0x4f4] ss:$8 sps:$4 sm:$0xff]  }
  0x68   :  { %2026 = vmatpush1.bf16.msra.mxu0 %v2544_v31  ;;  %1863 = vmatprep.subr.bf16.mxu1 %v2545_v32  ;;  %v222_v31 = vrot.slane %v3110_v2, %v3098_v51  ;;  %v2579_v32 = vld [vmem:[#allocation8 + $0xd0] ss:$8 sps:$4 sm:$0xff]  }
  0x69   :  { %2027 = vmatprep.subr.bf16.mxu0 %v2547_v33  ;;  %v2580_v33 = vld [vmem:[#allocation8 + $0x4d0] ss:$8 sps:$4 sm:$0xff]  }
  0x6b   :  { %1864 = vmatpush1.bf16.msra.mxu1 %v2549_v34  ;;  %v263_v34 = vmax.f32 %v255_v24, 0.0  ;;  %v2628_v24 = vld [vmem:[#allocation8 + $0x554] ss:$8 sps:$4 sm:$0xff]  }
  0x6c   :  { %2028 = vmatpush1.bf16.msra.mxu0 %v2550_v35  ;;  %1865 = vmatprep.subr.bf16.mxu1 %v2551_v36  ;;  %v152_v35 = vcombine.low %v126_v26, %v130_v27  ;;  %v2581_v36 = vld [vmem:[#allocation8 + $0xe4] ss:$8 sps:$4 sm:$0xff]   ;;  %v2626_v26 = vld [vmem:[#allocation8 + $0x550] ss:$8 sps:$4 sm:$0xff]  }
  0x6d   :  { %2029 = vmatprep.subr.bf16.mxu0 %v2553_v38  ;;  %v259_v38 = vadd.f32 %v243_v22, %v167_v28  ;;  %v295_v63 = vpack.c.bf16 %v263_v34, %v263_v34  ;;  %v2620_v22 = vld [vmem:[#allocation8 + $0x540] ss:$8 sps:$4 sm:$0xff]   ;;  %v2631_v27 = vld [vmem:[#allocation8 + $0x164] ss:$8 sps:$4 sm:$0xff]  }
  0x6e   :  { %v2634_v28 = vld [vmem:[#allocation8 + $0x564] ss:$8 sps:$4 sm:$0xff]  }
  0x6f   :  { %1866 = vmatpush1.bf16.msra.mxu1 %v2555_v39  ;;  %v244_v39 = vcombine.low %v218_v30, %v222_v31  ;;  %v2632_v30 = vld [vmem:[#allocation8 + $0x560] ss:$8 sps:$4 sm:$0xff]   ;;  %v2637_v31 = vld [vmem:[#allocation8 + $0x174] ss:$8 sps:$4 sm:$0xff]  }
  0x70   :  { %2030 = vmatpush1.bf16.msra.mxu0 %v2556_v40  ;;  %1867 = vmatprep.subr.bf16.mxu1 %v2557_v41  ;;  %v279_v40 = vcombine.high %v263_v34, %v263_v34  ;;  %v256_v41 = vadd.f32 %v240_v29, %v164_v25  ;;  %v2623_v25 = vld [vmem:[#allocation8 + $0x150] ss:$8 sps:$4 sm:$0xff]   ;;  %v2629_v29 = vld [vmem:[#allocation8 + $0x160] ss:$8 sps:$4 sm:$0xff]  }
  0x71   :  { %2031 = vmatprep.subr.bf16.mxu0 %v2559_v43  ;;  %v168_v43 = vmul.f32 %v152_v35, %v76_v20  ;;  %v2622_v20 = vld [vmem:[#allocation8 + $0x544] ss:$8 sps:$4 sm:$0xff]   ;;  %v2638_v34 = vld [vmem:[#allocation8 + $0x570] ss:$8 sps:$4 sm:$0xff]  }
  0x72   :  { %v296_v47 = vpack.c.bf16 %v279_v40, %v279_v40  ;;  %v2643_v35 = vld [vmem:[#allocation8 + $0x184] ss:$8 sps:$4 sm:$0xff]   ;;  %v2652_v40 = vld [vmem:[#allocation8 + $0x594] ss:$8 sps:$4 sm:$0xff]  }
  0x73   :  { %1868 = vmatpush1.bf16.msra.mxu1 %v2561_v44  ;;  %v267_v44 = vmax.f32 %v259_v38, 0.0  ;;  %v260_v48 = vadd.f32 %v244_v39, %v168_v43  ;;  %v2644_v38 = vld [vmem:[#allocation8 + $0x580] ss:$8 sps:$4 sm:$0xff]   ;;  %v2649_v39 = vld [vmem:[#allocation8 + $0x194] ss:$8 sps:$4 sm:$0xff]  }
  0x74   :  { %2032 = vmatpush1.bf16.msra.mxu0 %v2562_v45  ;;  %1869 = vmatprep.subr.bf16.mxu1 %v2563_v46  ;;  %v2585_v45 = vld [vmem:[#allocation8 + $0xe0] ss:$8 sps:$4 sm:$0xff]   ;;  %v2650_v43 = vld [vmem:[#allocation8 + $0x590] ss:$8 sps:$4 sm:$0xff]  }
  0x75   :  { %2033 = vmatprep.subr.bf16.mxu0 %v2565_v49  ;;  %v2586_v46 = vld [vmem:[#allocation8 + $0x4e0] ss:$8 sps:$4 sm:$0xff]   ;;  %v2587_v49 = vld [vmem:[#allocation8 + $0xf4] ss:$8 sps:$4 sm:$0xff]   ;;  %v283_v51 = vcombine.high %v267_v44, %v267_v44  ;;  %1879 = vmatprep.mubr.bf16.mxu1 %v296_v47  ;;  %v303_v0 = vpack.c.bf16 %v267_v44, %v267_v44  ;;  %v2655_v44 = vld [vmem:[#allocation8 + $0x1a4] ss:$8 sps:$4 sm:$0xff]  }
  0x76   :  { %v2656_v47 = vld [vmem:[#allocation8 + $0x5a0] ss:$8 sps:$4 sm:$0xff]  }
  0x77   :  { %1870 = vmatpush1.bf16.msra.mxu1 %v2567_v52  ;;  %v3132_v52 = vmax.f32 %v256_v41, 0.0  ;;  %v304_v54 = vpack.c.bf16 %v283_v51, %v283_v51  ;;  %v2647_v41 = vld [vmem:[#allocation8 + $0x190] ss:$8 sps:$4 sm:$0xff]  }
  0x78   :  { %2034 = vmatpush1.bf16.msra.mxu0 %v2568_v53  ;;  %1871 = vmatprep.subr.bf16.mxu1 %v2569_v57  ;;  %v3134_v53 = vmax.f32 %v260_v48, 0.0  ;;  %v2591_v57 = vld [vmem:[#allocation8 + $0xf0] ss:$8 sps:$4 sm:$0xff]   ;;  %v2661_v48 = vld [vmem:[#allocation8 + $0x1b4] ss:$8 sps:$4 sm:$0xff]  }
  0x79   :  { %2035 = vmatprep.subr.bf16.mxu0 %v2571_v58  ;;  %v2592_v58 = vld [vmem:[#allocation8 + $0x4f0] ss:$8 sps:$4 sm:$0xff]   ;;  %2043 = vmatprep.mubr.bf16.mxu0 %v304_v54  ;;  %v280_v61 = vcombine.high %v3132_v52, %v3132_v52  ;;  %v2667_v54 = vld [vmem:[#allocation8 + $0x1c4] ss:$8 sps:$4 sm:$0xff]  }
  0x7a   :  { %v284_v62 = vcombine.high %v3134_v53, %v3134_v53  ;;  %v2662_v51 = vld [vmem:[#allocation8 + $0x5b0] ss:$8 sps:$4 sm:$0xff]  }
  0x7b   :  { %1872 = vmatpush1.bf16.msra.mxu1 %v2573_v13  ;;  %v298_v7 = vpack.c.bf16 %v280_v61, %v280_v61  ;;  %v2605_v13 = vld [vmem:[#allocation8 + $0x120] ss:$8 sps:$4 sm:$0xff]   ;;  %v2676_v61 = vld [vmem:[#allocation8 + $0x5d4] ss:$8 sps:$4 sm:$0xff]  }
  0x7c   :  { %2036 = vmatpush1.bf16.msra.mxu0 %v2574_v14  ;;  %1873 = vmatprep.subr.bf16.mxu1 %v2575_v18  ;;  %v306_v8 = vpack.c.bf16 %v284_v62, %v284_v62  ;;  %v2608_v14 = vld [vmem:[#allocation8 + $0x520] ss:$8 sps:$4 sm:$0xff]   ;;  %v2614_v18 = vld [vmem:[#allocation8 + $0x530] ss:$8 sps:$4 sm:$0xff]  }
  0x7d   :  { %2037 = vmatprep.subr.bf16.mxu0 %v2577_v19  ;;  %v2619_v19 = vld [vmem:[#allocation8 + $0x144] ss:$8 sps:$4 sm:$0xff]   ;;  %v2671_v62 = vld [vmem:[#allocation8 + $0x1d0] ss:$8 sps:$4 sm:$0xff]  }
  0x7f   :  { %1874 = vmatpush1.bf16.msra.mxu1 %v2579_v32  ;;  %v2640_v32 = vld [vmem:[#allocation8 + $0x574] ss:$8 sps:$4 sm:$0xff]  }
  0x80   :  { %2038 = vmatpush1.bf16.msra.mxu0 %v2580_v33  ;;  %1875 = vmatprep.subr.bf16.mxu1 %v2581_v36  ;;  %v2635_v33 = vld [vmem:[#allocation8 + $0x170] ss:$8 sps:$4 sm:$0xff]   ;;  %v2646_v36 = vld [vmem:[#allocation8 + $0x584] ss:$8 sps:$4 sm:$0xff]  }
  0x81   :  { %2039 = vmatprep.subr.bf16.mxu0 %v2583_v37  ;;  %v2641_v37 = vld [vmem:[#allocation8 + $0x180] ss:$8 sps:$4 sm:$0xff]  }
  0x83   :  { %1876 = vmatpush1.bf16.msra.mxu1 %v2585_v45  ;;  %v2658_v45 = vld [vmem:[#allocation8 + $0x5a4] ss:$8 sps:$4 sm:$0xff]  }
  0x84   :  { %2040 = vmatpush1.bf16.msra.mxu0 %v2586_v46  ;;  %1877 = vmatprep.subr.bf16.mxu1 %v2587_v49  ;;  %v2653_v46 = vld [vmem:[#allocation8 + $0x1a0] ss:$8 sps:$4 sm:$0xff]   ;;  %v2664_v49 = vld [vmem:[#allocation8 + $0x5b4] ss:$8 sps:$4 sm:$0xff]  }
  0x85   :  { %2041 = vmatprep.subr.bf16.mxu0 %v2589_v50  ;;  %v2659_v50 = vld [vmem:[#allocation8 + $0x1b0] ss:$8 sps:$4 sm:$0xff]  }
  0x87   :  { %1878 = vmatpush1.bf16.msra.mxu1 %v2591_v57  ;;  %v2670_v57 = vld [vmem:[#allocation8 + $0x5c4] ss:$8 sps:$4 sm:$0xff]  }
  0x88   :  { %2042 = vmatpush1.bf16.msra.mxu0 %v2592_v58  ;;  %1888 = vmatprep.subr.bf16.mxu1 %v2595_v59  ;;  %v2665_v58 = vld [vmem:[#allocation8 + $0x1c0] ss:$8 sps:$4 sm:$0xff]  }
  0x89   :  { %2052 = vmatprep.subr.bf16.mxu0 %v2598_v60  ;;  %v2668_v59 = vld [vmem:[#allocation8 + $0x5c0] ss:$8 sps:$4 sm:$0xff]   ;;  %v2673_v60 = vld [vmem:[#allocation8 + $0x1d4] ss:$8 sps:$4 sm:$0xff]  }
  0x8a   :  { %1880 = vmatmul.mubr.bf16.vlgmr.msra.gmra.mrb[0].mxu1 %v295_v63  ;;  %v2674_v63 = vld [vmem:[#allocation8 + $0x5d0] ss:$8 sps:$4 sm:$0xff]  }
  0x8b   :  { %2044 = vmatmul.mubr.bf16.vlgmr.msra.gmra.mrb[0].mxu0 %v303_v0  ;;  %1889 = vmatpush1.bf16.msra.mxu1 %v2593_v3  ;;  %v2679_v0 = vld [vmem:[#allocation8 + $0x1e4] ss:$8 sps:$4 sm:$0xff]  }
  0x8c   :  { %2053 = vmatpush1.bf16.msra.mxu0 %v2596_v4  ;;  %1890 = vmatprep.subr.bf16.mxu1 %v2601_v5  ;;  %v2682_v3 = vld [vmem:[#allocation8 + $0x5e4] ss:$8 sps:$4 sm:$0xff]   ;;  %v2677_v4 = vld [vmem:[#allocation8 + $0x1e0] ss:$8 sps:$4 sm:$0xff]  }
  0x8d   :  { %2054 = vmatprep.subr.bf16.mxu0 %v2604_v6  ;;  %1920 = vmatprep.mubr.bf16.mxu1 %v298_v7  ;;  %v2680_v5 = vld [vmem:[#allocation8 + $0x5e0] ss:$8 sps:$4 sm:$0xff]   ;;  %v101_v6 = vsub.s32 4, %v3090_v42  ;;  %v2685_v7 = vld [vmem:[#allocation8 + $0x1f4] ss:$8 sps:$4 sm:$0xff]  }
  0x8e   :  { %2084 = vmatprep.mubr.bf16.mxu0 %v306_v8  ;;  %v2688_v8 = vld [vmem:[#allocation8 + $0x5f4] ss:$8 sps:$4 sm:$0xff]  }
  0x8f   :  { %1891 = vmatpush1.bf16.msra.mxu1 %v2599_v9  ;;  %v105_v9 = vsub.s32 5, %v3090_v42 }
  0x90   :  { %2055 = vmatpush1.bf16.msra.mxu0 %v2602_v10  ;;  %1892 = vmatprep.subr.bf16.mxu1 %v2607_v11  ;;  %v2683_v10 = vld [vmem:[#allocation8 + $0x1f0] ss:$8 sps:$4 sm:$0xff]  }
  0x91   :  { %2056 = vmatprep.subr.bf16.mxu0 %v2610_v12  ;;  %v2686_v11 = vld [vmem:[#allocation8 + $0x5f0] ss:$8 sps:$4 sm:$0xff]   ;;  %v2691_v12 = vld [vmem:[#allocation8 + $0x204] ss:$8 sps:$4 sm:$0xff]  }
  0x93   :  { %1893 = vmatpush1.bf16.msra.mxu1 %v2605_v13  ;;  %v2694_v13 = vld [vmem:[#allocation8 + $0x604] ss:$8 sps:$4 sm:$0xff]  }
  0x94   :  { %2057 = vmatpush1.bf16.msra.mxu0 %v2608_v14  ;;  %1894 = vmatprep.subr.bf16.mxu1 %v2613_v15  ;;  %v102_v14 = vrot.slane %v3100_v55, %v101_v6  ;;  %v106_v15 = vrot.slane %v3100_v55, %v105_v9  ;;  %v226_v55 = vrot.slane %v3110_v2, %v101_v6 }
  0x95   :  { %2058 = vmatprep.subr.bf16.mxu0 %v2616_v16  ;;  %v134_v16 = vrot.slane %v3108_v1, %v101_v6 }
  0x97   :  { %1895 = vmatpush1.bf16.msra.mxu1 %v2611_v17  ;;  %v138_v17 = vrot.slane %v3108_v1, %v105_v9  ;;  %v2697_v1 = vld [vmem:[#allocation8 + $0x214] ss:$8 sps:$4 sm:$0xff]  }
  0x98   :  { %2059 = vmatpush1.bf16.msra.mxu0 %v2614_v18  ;;  %1896 = vmatprep.subr.bf16.mxu1 %v2619_v19  ;;  %v297_v18 = vpack.c.bf16 %v3132_v52, %v3132_v52  ;;  %v305_v19 = vpack.c.bf16 %v3134_v53, %v3134_v53  ;;  %v149_v52 = vcombine.low %v102_v14, %v106_v15  ;;  %v2748_v14 = vld [vmem:[#allocation8 + $0x694] ss:$8 sps:$4 sm:$0xff]   ;;  %v2743_v15 = vld [vmem:[#allocation8 + $0x290] ss:$8 sps:$4 sm:$0xff]  }
  0x99   :  { %2060 = vmatprep.subr.bf16.mxu0 %v2622_v20  ;;  %v194_v20 = vrot.slane %v3102_v56, %v101_v6  ;;  %v153_v53 = vcombine.low %v134_v16, %v138_v17  ;;  %v2736_v6 = vld [vmem:[#allocation8 + $0x674] ss:$8 sps:$4 sm:$0xff]   ;;  %v2746_v16 = vld [vmem:[#allocation8 + $0x690] ss:$8 sps:$4 sm:$0xff]   ;;  %v2751_v17 = vld [vmem:[#allocation8 + $0x2a4] ss:$8 sps:$4 sm:$0xff]  }
  0x9b   :  { %1897 = vmatpush1.bf16.msra.mxu1 %v2617_v21  ;;  %v198_v21 = vrot.slane %v3102_v56, %v105_v9  ;;  %v2698_v56 = vld [vmem:[#allocation8 + $0x610] ss:$8 sps:$4 sm:$0xff]  }
  0x9c   :  { %2061 = vmatpush1.bf16.msra.mxu0 %v2620_v22  ;;  %1898 = vmatprep.subr.bf16.mxu1 %v2625_v23  ;;  %v2689_v22 = vld [vmem:[#allocation8 + $0x200] ss:$8 sps:$4 sm:$0xff]  }
  0x9d   :  { %2062 = vmatprep.subr.bf16.mxu0 %v2628_v24  ;;  %v2692_v23 = vld [vmem:[#allocation8 + $0x600] ss:$8 sps:$4 sm:$0xff]   ;;  %v230_v24 = vrot.slane %v3110_v2, %v105_v9  ;;  %v2703_v2 = vld [vmem:[#allocation8 + $0x224] ss:$8 sps:$4 sm:$0xff]  }
  0x9e   :  { %v2739_v9 = vld [vmem:[#allocation8 + $0x284] ss:$8 sps:$4 sm:$0xff]  }
  0x9f   :  { %1899 = vmatpush1.bf16.msra.mxu1 %v2623_v25  ;;  %v2700_v25 = vld [vmem:[#allocation8 + $0x614] ss:$8 sps:$4 sm:$0xff]  }
  0xa0   :  { %2063 = vmatpush1.bf16.msra.mxu0 %v2626_v26  ;;  %1900 = vmatprep.subr.bf16.mxu1 %v2631_v27  ;;  %v3154_v26 = vld [vmem:[#allocation2 + $0x8] sm:$0xff]  ;;  %v2695_v27 = vld [vmem:[#allocation8 + $0x210] ss:$8 sps:$4 sm:$0xff]  }
  0xa1   :  { %2064 = vmatprep.subr.bf16.mxu0 %v2634_v28  ;;  %v73_v28 = vunpack.c.l.bf16 %v3154_v26 }
  0xa3   :  { %1901 = vmatpush1.bf16.msra.mxu1 %v2629_v29  ;;  %v241_v29 = vcombine.low %v194_v20, %v198_v21  ;;  %v2754_v20 = vld [vmem:[#allocation8 + $0x6a4] ss:$8 sps:$4 sm:$0xff]   ;;  %v2749_v21 = vld [vmem:[#allocation8 + $0x2a0] ss:$8 sps:$4 sm:$0xff]  }
  0xa4   :  { %2065 = vmatpush1.bf16.msra.mxu0 %v2632_v30  ;;  %1902 = vmatprep.subr.bf16.mxu1 %v2637_v31  ;;  %v3157_v30 = vld [vmem:[#allocation2 + $0x18] sm:$0xff] }
  0xa5   :  { %2066 = vmatprep.subr.bf16.mxu0 %v2640_v32  ;;  %v77_v31 = vunpack.c.l.bf16 %v3157_v30  ;;  %v245_v32 = vcombine.low %v226_v55, %v230_v24  ;;  %v2881_v55 = vld [vmem:[#allocation5] sm:$0xff] }
  0xa7   :  { %1903 = vmatpush1.bf16.msra.mxu1 %v2635_v33  ;;  %v2706_v33 = vld [vmem:[#allocation8 + $0x624] ss:$8 sps:$4 sm:$0xff]  }
  0xa8   :  { %2067 = vmatpush1.bf16.msra.mxu0 %v2638_v34  ;;  %1904 = vmatprep.subr.bf16.mxu1 %v2643_v35  ;;  %v165_v34 = vmul.f32 %v149_v52, %v73_v28  ;;  %v169_v35 = vmul.f32 %v153_v53, %v77_v31  ;;  %v2882_v52 = vld [vmem:[#allocation5 + $0x8] sm:$0xff]  ;;  %v2883_v31 = vld [vmem:[#allocation7] sm:$0xff] }
  0xa9   :  { %2068 = vmatprep.subr.bf16.mxu0 %v2646_v36  ;;  %v2701_v36 = vld [vmem:[#allocation8 + $0x220] ss:$8 sps:$4 sm:$0xff]  }
  0xab   :  { %1905 = vmatpush1.bf16.msra.mxu1 %v2641_v37  ;;  %v2704_v37 = vld [vmem:[#allocation8 + $0x620] ss:$8 sps:$4 sm:$0xff]  }
  0xac   :  { %2069 = vmatpush1.bf16.msra.mxu0 %v2644_v38  ;;  %1906 = vmatprep.subr.bf16.mxu1 %v2649_v39  ;;  %v257_v38 = vadd.f32 %v241_v29, %v165_v34  ;;  %v2709_v39 = vld [vmem:[#allocation8 + $0x234] ss:$8 sps:$4 sm:$0xff]   ;;  %v2763_v29 = vld [vmem:[#allocation8 + $0x2c4] ss:$8 sps:$4 sm:$0xff]  }
  0xad   :  { %2070 = vmatprep.subr.bf16.mxu0 %v2652_v40  ;;  %v261_v40 = vadd.f32 %v245_v32, %v169_v35  ;;  %v2884_v34 = vld [vmem:[#allocation7 + $0x8] sm:$0xff] }
  0xaf   :  { %1907 = vmatpush1.bf16.msra.mxu1 %v2647_v41  ;;  %v2712_v41 = vld [vmem:[#allocation8 + $0x634] ss:$8 sps:$4 sm:$0xff]  }
  0xb0   :  { %2071 = vmatpush1.bf16.msra.mxu0 %v2650_v43  ;;  %1908 = vmatprep.subr.bf16.mxu1 %v2655_v44  ;;  %v3160_v43 = vmax.f32 %v257_v38, 0.0  ;;  %v3162_v44 = vmax.f32 %v261_v40, 0.0  ;;  %v2761_v40 = vld [vmem:[#allocation8 + $0x2c0] ss:$8 sps:$4 sm:$0xff]  }
  0xb1   :  { %2072 = vmatprep.subr.bf16.mxu0 %v2658_v45  ;;  %v2707_v45 = vld [vmem:[#allocation8 + $0x230] ss:$8 sps:$4 sm:$0xff]  }
  0xb3   :  { %1909 = vmatpush1.bf16.msra.mxu1 %v2653_v46  ;;  %v2710_v46 = vld [vmem:[#allocation8 + $0x630] ss:$8 sps:$4 sm:$0xff]  }
  0xb4   :  { %2073 = vmatpush1.bf16.msra.mxu0 %v2656_v47  ;;  %1910 = vmatprep.subr.bf16.mxu1 %v2661_v48  ;;  %v281_v47 = vcombine.high %v3160_v43, %v3160_v43  ;;  %v2715_v48 = vld [vmem:[#allocation8 + $0x244] ss:$8 sps:$4 sm:$0xff]  }
  0xb5   :  { %2074 = vmatprep.subr.bf16.mxu0 %v2664_v49  ;;  %v285_v49 = vcombine.high %v3162_v44, %v3162_v44 }
  0xb7   :  { %1911 = vmatpush1.bf16.msra.mxu1 %v2659_v50  ;;  %v2718_v50 = vld [vmem:[#allocation8 + $0x644] ss:$8 sps:$4 sm:$0xff]  }
  0xb8   :  { %2075 = vmatpush1.bf16.msra.mxu0 %v2662_v51  ;;  %1912 = vmatprep.subr.bf16.mxu1 %v2667_v54  ;;  %v300_v51 = vpack.c.bf16 %v281_v47, %v281_v47  ;;  %v308_v54 = vpack.c.bf16 %v285_v49, %v285_v49 }
  0xb9   :  { %2076 = vmatprep.subr.bf16.mxu0 %v2670_v57  ;;  %v2713_v57 = vld [vmem:[#allocation8 + $0x240] ss:$8 sps:$4 sm:$0xff]  }
  0xbb   :  { %1913 = vmatpush1.bf16.msra.mxu1 %v2665_v58  ;;  %v2716_v58 = vld [vmem:[#allocation8 + $0x640] ss:$8 sps:$4 sm:$0xff]  }
  0xbc   :  { %2077 = vmatpush1.bf16.msra.mxu0 %v2668_v59  ;;  %1914 = vmatprep.subr.bf16.mxu1 %v2673_v60  ;;  %v2721_v59 = vld [vmem:[#allocation8 + $0x254] ss:$8 sps:$4 sm:$0xff]  }
  0xbd   :  { %2078 = vmatprep.subr.bf16.mxu0 %v2676_v61  ;;  %v2724_v60 = vld [vmem:[#allocation8 + $0x654] ss:$8 sps:$4 sm:$0xff]   ;;  %v2719_v61 = vld [vmem:[#allocation8 + $0x250] ss:$8 sps:$4 sm:$0xff]  }
  0xbf   :  { %1915 = vmatpush1.bf16.msra.mxu1 %v2671_v62  ;;  %v2722_v62 = vld [vmem:[#allocation8 + $0x650] ss:$8 sps:$4 sm:$0xff]  }
  0xc0   :  { %2079 = vmatpush1.bf16.msra.mxu0 %v2674_v63  ;;  %1916 = vmatprep.subr.bf16.mxu1 %v2679_v0  ;;  %v2727_v63 = vld [vmem:[#allocation8 + $0x264] ss:$8 sps:$4 sm:$0xff]  }
  0xc1   :  { %2080 = vmatprep.subr.bf16.mxu0 %v2682_v3  ;;  %v2730_v0 = vld [vmem:[#allocation8 + $0x664] ss:$8 sps:$4 sm:$0xff]   ;;  %v2725_v3 = vld [vmem:[#allocation8 + $0x260] ss:$8 sps:$4 sm:$0xff]  }
  0xc3   :  { %1917 = vmatpush1.bf16.msra.mxu1 %v2677_v4  ;;  %v2728_v4 = vld [vmem:[#allocation8 + $0x660] ss:$8 sps:$4 sm:$0xff]  }
  0xc4   :  { %2081 = vmatpush1.bf16.msra.mxu0 %v2680_v5  ;;  %1918 = vmatprep.subr.bf16.mxu1 %v2685_v7  ;;  %v2733_v5 = vld [vmem:[#allocation8 + $0x274] ss:$8 sps:$4 sm:$0xff]   ;;  %v2731_v7 = vld [vmem:[#allocation8 + $0x270] ss:$8 sps:$4 sm:$0xff]  }
  0xc5   :  { %2082 = vmatprep.subr.bf16.mxu0 %v2688_v8  ;;  %v2734_v8 = vld [vmem:[#allocation8 + $0x670] ss:$8 sps:$4 sm:$0xff]  }
  0xc7   :  { %1919 = vmatpush1.bf16.msra.mxu1 %v2683_v10  ;;  %v2742_v10 = vld [vmem:[#allocation8 + $0x684] ss:$8 sps:$4 sm:$0xff]  }
  0xc8   :  { %2083 = vmatpush1.bf16.msra.mxu0 %v2686_v11  ;;  %1929 = vmatprep.subr.bf16.mxu1 %v2691_v12  ;;  %v2737_v11 = vld [vmem:[#allocation8 + $0x280] ss:$8 sps:$4 sm:$0xff]  }
  0xc9   :  { %2093 = vmatprep.subr.bf16.mxu0 %v2694_v13  ;;  %v2740_v12 = vld [vmem:[#allocation8 + $0x680] ss:$8 sps:$4 sm:$0xff]   ;;  %v2745_v13 = vld [vmem:[#allocation8 + $0x294] ss:$8 sps:$4 sm:$0xff]  }
  0xca   :  { %1921 = vmatmul.mubr.bf16.vlgmr.msra.gmra.mrb[0].mxu1 %v297_v18  ;;  %v109_v18 = vsub.s32 6, %v3090_v42 }
  0xcb   :  { %2085 = vmatmul.mubr.bf16.vlgmr.msra.gmra.mrb[0].mxu0 %v305_v19  ;;  %1930 = vmatpush1.bf16.msra.mxu1 %v2689_v22  ;;  %v113_v19 = vsub.s32 7, %v3090_v42  ;;  %v2752_v22 = vld [vmem:[#allocation8 + $0x6a0] ss:$8 sps:$4 sm:$0xff]   ;;  %v2758_v42 = vld [vmem:[#allocation8 + $0x6b0] ss:$8 sps:$4 sm:$0xff]  }
  0xcc   :  { %2094 = vmatpush1.bf16.msra.mxu0 %v2692_v23  ;;  %1931 = vmatprep.subr.bf16.mxu1 %v2697_v1  ;;  %v2757_v23 = vld [vmem:[#allocation8 + $0x2b4] ss:$8 sps:$4 sm:$0xff]   ;;  %v110_v24 = vrot.slane %v2881_v55, %v109_v18  ;;  %v142_v53 = vrot.slane %v2882_v52, %v109_v18  ;;  %v202_v32 = vrot.slane %v2883_v31, %v109_v18 }
  0xcd   :  { %2095 = vmatprep.subr.bf16.mxu0 %v2700_v25  ;;  %1961 = vmatprep.mubr.bf16.mxu1 %v300_v51  ;;  %v114_v1 = vrot.slane %v2881_v55, %v113_v19  ;;  %v2760_v25 = vld [vmem:[#allocation8 + $0x6b4] ss:$8 sps:$4 sm:$0xff]   ;;  %v234_v35 = vrot.slane %v2884_v34, %v109_v18  ;;  %v2767_v51 = vld [vmem:[#allocation8 + $0x2d0] ss:$8 sps:$4 sm:$0xff]  }
  0xce   :  { %2125 = vmatprep.mubr.bf16.mxu0 %v308_v54  ;;  %v2778_v54 = vld [vmem:[#allocation8 + $0x6e4] ss:$8 sps:$4 sm:$0xff]   ;;  %v2794_v18 = vld [vmem:[#allocation8 + $0x710] ss:$8 sps:$4 sm:$0xff]  }
  0xcf   :  { %1932 = vmatpush1.bf16.msra.mxu1 %v2695_v27  ;;  %v146_v27 = vrot.slane %v2882_v52, %v113_v19  ;;  %v150_v28 = vcombine.low %v110_v24, %v114_v1  ;;  %v2806_v55 = vld [vmem:[#allocation8 + $0x730] ss:$8 sps:$4 sm:$0xff]   ;;  %v2811_v24 = vld [vmem:[#allocation8 + $0x344] ss:$8 sps:$4 sm:$0xff]   ;;  %v2812_v52 = vld [vmem:[#allocation8 + $0x740] ss:$8 sps:$4 sm:$0xff]  }
  0xd0   :  { %2096 = vmatpush1.bf16.msra.mxu0 %v2698_v56  ;;  %1933 = vmatprep.subr.bf16.mxu1 %v2703_v2  ;;  %v2755_v56 = vld [vmem:[#allocation8 + $0x2b0] ss:$8 sps:$4 sm:$0xff]   ;;  %v2766_v2 = vld [vmem:[#allocation8 + $0x6c4] ss:$8 sps:$4 sm:$0xff]  }
  0xd1   :  { %2097 = vmatprep.subr.bf16.mxu0 %v2706_v33  ;;  %v206_v33 = vrot.slane %v2883_v31, %v113_v19  ;;  %v154_v38 = vcombine.low %v142_v53, %v146_v27  ;;  %v2814_v1 = vld [vmem:[#allocation8 + $0x744] ss:$8 sps:$4 sm:$0xff]   ;;  %v2817_v53 = vld [vmem:[#allocation8 + $0x354] ss:$8 sps:$4 sm:$0xff]   ;;  %v2824_v31 = vld [vmem:[#allocation8 + $0x760] ss:$8 sps:$4 sm:$0xff]  }
  0xd2   :  { %v2820_v27 = vld [vmem:[#allocation8 + $0x754] ss:$8 sps:$4 sm:$0xff]  }
  0xd3   :  { %1934 = vmatpush1.bf16.msra.mxu1 %v2701_v36  ;;  %v74_v36 = vunpack.c.h.bf16 %v3154_v26  ;;  %v2770_v26 = vld [vmem:[#allocation8 + $0x6d0] ss:$8 sps:$4 sm:$0xff]  }
  0xd4   :  { %2098 = vmatpush1.bf16.msra.mxu0 %v2704_v37  ;;  %1935 = vmatprep.subr.bf16.mxu1 %v2709_v39  ;;  %v78_v37 = vunpack.c.h.bf16 %v3157_v30  ;;  %v238_v39 = vrot.slane %v2884_v34, %v113_v19  ;;  %v2775_v30 = vld [vmem:[#allocation8 + $0x2e4] ss:$8 sps:$4 sm:$0xff]   ;;  %v2797_v19 = vld [vmem:[#allocation8 + $0x320] ss:$8 sps:$4 sm:$0xff]   ;;  %v2827_v34 = vld [vmem:[#allocation8 + $0x370] ss:$8 sps:$4 sm:$0xff]  }
  0xd5   :  { %2099 = vmatprep.subr.bf16.mxu0 %v2712_v41  ;;  %v2764_v41 = vld [vmem:[#allocation8 + $0x6c0] ss:$8 sps:$4 sm:$0xff]   ;;  %v166_v47 = vmul.f32 %v150_v28, %v74_v36  ;;  %v2823_v28 = vld [vmem:[#allocation8 + $0x364] ss:$8 sps:$4 sm:$0xff]  }
  0xd6   :  { %v170_v49 = vmul.f32 %v154_v38, %v78_v37  ;;  %v2835_v36 = vld [vmem:[#allocation8 + $0x384] ss:$8 sps:$4 sm:$0xff]   ;;  %v2833_v38 = vld [vmem:[#allocation8 + $0x380] ss:$8 sps:$4 sm:$0xff]  }
  0xd7   :  { %1936 = vmatpush1.bf16.msra.mxu1 %v2707_v45  ;;  %v2769_v45 = vld [vmem:[#allocation8 + $0x2d4] ss:$8 sps:$4 sm:$0xff]   ;;  %v2838_v37 = vld [vmem:[#allocation8 + $0x784] ss:$8 sps:$4 sm:$0xff]  }
  0xd8   :  { %2100 = vmatpush1.bf16.msra.mxu0 %v2710_v46  ;;  %1937 = vmatprep.subr.bf16.mxu1 %v2715_v48  ;;  %v2772_v46 = vld [vmem:[#allocation8 + $0x6d4] ss:$8 sps:$4 sm:$0xff]   ;;  %v242_v48 = vcombine.low %v202_v32, %v206_v33 }
  0xd9   :  { %2101 = vmatprep.subr.bf16.mxu0 %v2718_v50  ;;  %v246_v50 = vcombine.low %v234_v35, %v238_v39  ;;  %v2829_v32 = vld [vmem:[#allocation8 + $0x374] ss:$8 sps:$4 sm:$0xff]   ;;  %v2830_v35 = vld [vmem:[#allocation8 + $0x770] ss:$8 sps:$4 sm:$0xff]   ;;  %v2836_v39 = vld [vmem:[#allocation8 + $0x780] ss:$8 sps:$4 sm:$0xff]  }
  0xda   :  { %v2832_v33 = vld [vmem:[#allocation8 + $0x774] ss:$8 sps:$4 sm:$0xff]  }
  0xdb   :  { %1938 = vmatpush1.bf16.msra.mxu1 %v2713_v57  ;;  %v258_v57 = vadd.f32 %v242_v48, %v166_v47  ;;  %v2847_v47 = vld [vmem:[#allocation8 + $0x3a4] ss:$8 sps:$4 sm:$0xff]  }
  0xdc   :  { %2102 = vmatpush1.bf16.msra.mxu0 %v2716_v58  ;;  %1939 = vmatprep.subr.bf16.mxu1 %v2721_v59  ;;  %v262_v58 = vadd.f32 %v246_v50, %v170_v49  ;;  %v2773_v59 = vld [vmem:[#allocation8 + $0x2e0] ss:$8 sps:$4 sm:$0xff]   ;;  %v2850_v48 = vld [vmem:[#allocation8 + $0x7a4] ss:$8 sps:$4 sm:$0xff]  }
  0xdd   :  { %2103 = vmatprep.subr.bf16.mxu0 %v2724_v60  ;;  %v2776_v60 = vld [vmem:[#allocation8 + $0x6e0] ss:$8 sps:$4 sm:$0xff]  }
  0xde   :  { %v2845_v49 = vld [vmem:[#allocation8 + $0x3a0] ss:$8 sps:$4 sm:$0xff]  }
  0xdf   :  { %1940 = vmatpush1.bf16.msra.mxu1 %v2719_v61  ;;  %v2781_v61 = vld [vmem:[#allocation8 + $0x2f4] ss:$8 sps:$4 sm:$0xff]   ;;  %v2848_v50 = vld [vmem:[#allocation8 + $0x7a0] ss:$8 sps:$4 sm:$0xff]  }
  0xe0   :  { %2104 = vmatpush1.bf16.msra.mxu0 %v2722_v62  ;;  %1941 = vmatprep.subr.bf16.mxu1 %v2727_v63  ;;  %v2784_v62 = vld [vmem:[#allocation8 + $0x6f4] ss:$8 sps:$4 sm:$0xff]   ;;  %v3172_v63 = vmax.f32 %v258_v57, 0.0  ;;  %v2859_v57 = vld [vmem:[#allocation8 + $0x3c4] ss:$8 sps:$4 sm:$0xff]  }
  0xe1   :  { %2105 = vmatprep.subr.bf16.mxu0 %v2730_v0  ;;  %v3174_v0 = vmax.f32 %v262_v58, 0.0  ;;  %v2862_v58 = vld [vmem:[#allocation8 + $0x7c4] ss:$8 sps:$4 sm:$0xff]  }
  0xe3   :  { %1942 = vmatpush1.bf16.msra.mxu1 %v2725_v3  ;;  %v2779_v3 = vld [vmem:[#allocation8 + $0x2f0] ss:$8 sps:$4 sm:$0xff]  }
  0xe4   :  { %2106 = vmatpush1.bf16.msra.mxu0 %v2728_v4  ;;  %1943 = vmatprep.subr.bf16.mxu1 %v2733_v5  ;;  %v2782_v4 = vld [vmem:[#allocation8 + $0x6f0] ss:$8 sps:$4 sm:$0xff]   ;;  %v2787_v5 = vld [vmem:[#allocation8 + $0x304] ss:$8 sps:$4 sm:$0xff]  }
  0xe5   :  { %2107 = vmatprep.subr.bf16.mxu0 %v2736_v6  ;;  %v2790_v6 = vld [vmem:[#allocation8 + $0x704] ss:$8 sps:$4 sm:$0xff]  }
  0xe7   :  { %1944 = vmatpush1.bf16.msra.mxu1 %v2731_v7  ;;  %v282_v7 = vcombine.high %v3172_v63, %v3172_v63 }
  0xe8   :  { %2108 = vmatpush1.bf16.msra.mxu0 %v2734_v8  ;;  %1945 = vmatprep.subr.bf16.mxu1 %v2739_v9  ;;  %v286_v8 = vcombine.high %v3174_v0, %v3174_v0  ;;  %v299_v9 = vpack.c.bf16 %v3160_v43, %v3160_v43  ;;  %v2799_v43 = vld [vmem:[#allocation8 + $0x324] ss:$8 sps:$4 sm:$0xff]  }
  0xe9   :  { %2109 = vmatprep.subr.bf16.mxu0 %v2742_v10  ;;  %v307_v10 = vpack.c.bf16 %v3162_v44, %v3162_v44  ;;  %v2802_v44 = vld [vmem:[#allocation8 + $0x724] ss:$8 sps:$4 sm:$0xff]  }
  0xeb   :  { %1946 = vmatpush1.bf16.msra.mxu1 %v2737_v11  ;;  %v2785_v11 = vld [vmem:[#allocation8 + $0x300] ss:$8 sps:$4 sm:$0xff]  }
  0xec   :  { %2110 = vmatpush1.bf16.msra.mxu0 %v2740_v12  ;;  %1947 = vmatprep.subr.bf16.mxu1 %v2745_v13  ;;  %v2788_v12 = vld [vmem:[#allocation8 + $0x700] ss:$8 sps:$4 sm:$0xff]   ;;  %v2793_v13 = vld [vmem:[#allocation8 + $0x314] ss:$8 sps:$4 sm:$0xff]  }
  0xed   :  { %2111 = vmatprep.subr.bf16.mxu0 %v2748_v14  ;;  %v2796_v14 = vld [vmem:[#allocation8 + $0x714] ss:$8 sps:$4 sm:$0xff]  }
  0xef   :  { %1948 = vmatpush1.bf16.msra.mxu1 %v2743_v15  ;;  %v302_v15 = vpack.c.bf16 %v282_v7, %v282_v7  ;;  %v2869_v7 = vld [vmem:[#allocation8 + $0x3e0] ss:$8 sps:$4 sm:$0xff]  }
  0xf0   :  { %2112 = vmatpush1.bf16.msra.mxu0 %v2746_v16  ;;  %1949 = vmatprep.subr.bf16.mxu1 %v2751_v17  ;;  %v310_v16 = vpack.c.bf16 %v286_v8, %v286_v8  ;;  %v2791_v17 = vld [vmem:[#allocation8 + $0x310] ss:$8 sps:$4 sm:$0xff]   ;;  %v2872_v8 = vld [vmem:[#allocation8 + $0x7e0] ss:$8 sps:$4 sm:$0xff]  }
  0xf1   :  { %2113 = vmatprep.subr.bf16.mxu0 %v2754_v20  ;;  %v2800_v20 = vld [vmem:[#allocation8 + $0x720] ss:$8 sps:$4 sm:$0xff]  }
  0xf3   :  { %1950 = vmatpush1.bf16.msra.mxu1 %v2749_v21  ;;  %v2805_v21 = vld [vmem:[#allocation8 + $0x334] ss:$8 sps:$4 sm:$0xff]  }
  0xf4   :  { %2114 = vmatpush1.bf16.msra.mxu0 %v2752_v22  ;;  %1951 = vmatprep.subr.bf16.mxu1 %v2757_v23  ;;  %v2808_v22 = vld [vmem:[#allocation8 + $0x734] ss:$8 sps:$4 sm:$0xff]   ;;  %v2803_v23 = vld [vmem:[#allocation8 + $0x330] ss:$8 sps:$4 sm:$0xff]  }
  0xf5   :  { %2115 = vmatprep.subr.bf16.mxu0 %v2760_v25  ;;  %v2809_v25 = vld [vmem:[#allocation8 + $0x340] ss:$8 sps:$4 sm:$0xff]  }
  0xf7   :  { %1952 = vmatpush1.bf16.msra.mxu1 %v2755_v56  ;;  %v2815_v56 = vld [vmem:[#allocation8 + $0x350] ss:$8 sps:$4 sm:$0xff]  }
  0xf8   :  { %2116 = vmatpush1.bf16.msra.mxu0 %v2758_v42  ;;  %1953 = vmatprep.subr.bf16.mxu1 %v2763_v29  ;;  %v2818_v42 = vld [vmem:[#allocation8 + $0x750] ss:$8 sps:$4 sm:$0xff]   ;;  %v2826_v29 = vld [vmem:[#allocation8 + $0x764] ss:$8 sps:$4 sm:$0xff]  }
  0xf9   :  { %2117 = vmatprep.subr.bf16.mxu0 %v2766_v2  ;;  %v2821_v2 = vld [vmem:[#allocation8 + $0x360] ss:$8 sps:$4 sm:$0xff]  }
  0xfb   :  { %1954 = vmatpush1.bf16.msra.mxu1 %v2761_v40  ;;  %v2841_v40 = vld [vmem:[#allocation8 + $0x394] ss:$8 sps:$4 sm:$0xff]  }
  0xfc   :  { %2118 = vmatpush1.bf16.msra.mxu0 %v2764_v41  ;;  %1955 = vmatprep.subr.bf16.mxu1 %v2769_v45  ;;  %v2844_v41 = vld [vmem:[#allocation8 + $0x794] ss:$8 sps:$4 sm:$0xff]   ;;  %v2839_v45 = vld [vmem:[#allocation8 + $0x390] ss:$8 sps:$4 sm:$0xff]  }
  0xfd   :  { %2119 = vmatprep.subr.bf16.mxu0 %v2772_v46  ;;  %v2842_v46 = vld [vmem:[#allocation8 + $0x790] ss:$8 sps:$4 sm:$0xff]  }
  0xff   :  { %1956 = vmatpush1.bf16.msra.mxu1 %v2767_v51  ;;  %v2853_v51 = vld [vmem:[#allocation8 + $0x3b4] ss:$8 sps:$4 sm:$0xff]  }
 0x100   :  { %2120 = vmatpush1.bf16.msra.mxu0 %v2770_v26  ;;  %1957 = vmatprep.subr.bf16.mxu1 %v2775_v30  ;;  %v2856_v26 = vld [vmem:[#allocation8 + $0x7b4] ss:$8 sps:$4 sm:$0xff]   ;;  %v2851_v30 = vld [vmem:[#allocation8 + $0x3b0] ss:$8 sps:$4 sm:$0xff]  }
 0x101   :  { %2121 = vmatprep.subr.bf16.mxu0 %v2778_v54  ;;  %v2854_v54 = vld [vmem:[#allocation8 + $0x7b0] ss:$8 sps:$4 sm:$0xff]  }
 0x103   :  { %1958 = vmatpush1.bf16.msra.mxu1 %v2773_v59  ;;  %v2857_v59 = vld [vmem:[#allocation8 + $0x3c0] ss:$8 sps:$4 sm:$0xff]  }
 0x104   :  { %2122 = vmatpush1.bf16.msra.mxu0 %v2776_v60  ;;  %1959 = vmatprep.subr.bf16.mxu1 %v2781_v61  ;;  %v2860_v60 = vld [vmem:[#allocation8 + $0x7c0] ss:$8 sps:$4 sm:$0xff]   ;;  %v2865_v61 = vld [vmem:[#allocation8 + $0x3d4] ss:$8 sps:$4 sm:$0xff]  }
 0x105   :  { %2123 = vmatprep.subr.bf16.mxu0 %v2784_v62  ;;  %v2868_v62 = vld [vmem:[#allocation8 + $0x7d4] ss:$8 sps:$4 sm:$0xff]  }
 0x107   :  { %1960 = vmatpush1.bf16.msra.mxu1 %v2779_v3  ;;  %v2863_v3 = vld [vmem:[#allocation8 + $0x3d0] ss:$8 sps:$4 sm:$0xff]  }
 0x108   :  { %2124 = vmatpush1.bf16.msra.mxu0 %v2782_v4  ;;  %1970 = vmatprep.subr.bf16.mxu1 %v2787_v5  ;;  %v2866_v4 = vld [vmem:[#allocation8 + $0x7d0] ss:$8 sps:$4 sm:$0xff]   ;;  %v2871_v5 = vld [vmem:[#allocation8 + $0x3e4] ss:$8 sps:$4 sm:$0xff]  }
 0x109   :  { %2134 = vmatprep.subr.bf16.mxu0 %v2790_v6  ;;  %v2874_v6 = vld [vmem:[#allocation8 + $0x7e4] ss:$8 sps:$4 sm:$0xff]  }
 0x10a   :  { %1962 = vmatmul.mubr.bf16.vlgmr.msra.gmra.mrb[0].mxu1 %v299_v9  ;;  %v2877_v9 = vld [vmem:[#allocation8 + $0x3f4] ss:$8 sps:$4 sm:$0xff]  }
 0x10b   :  { %2126 = vmatmul.mubr.bf16.vlgmr.msra.gmra.mrb[0].mxu0 %v307_v10  ;;  %1971 = vmatpush1.bf16.msra.mxu1 %v2785_v11  ;;  %v2880_v10 = vld [vmem:[#allocation8 + $0x7f4] ss:$8 sps:$4 sm:$0xff]   ;;  %v2875_v11 = vld [vmem:[#allocation8 + $0x3f0] ss:$8 sps:$4 sm:$0xff]  }
 0x10c   :  { %2135 = vmatpush1.bf16.msra.mxu0 %v2788_v12  ;;  %1972 = vmatprep.subr.bf16.mxu1 %v2793_v13  ;;  %v2878_v12 = vld [vmem:[#allocation8 + $0x7f0] ss:$8 sps:$4 sm:$0xff]   ;;  %v301_v13 = vpack.c.bf16 %v3172_v63, %v3172_v63 }
 0x10d   :  { %2136 = vmatprep.subr.bf16.mxu0 %v2796_v14  ;;  %2002 = vmatprep.mubr.bf16.mxu1 %v302_v15  ;;  %v309_v14 = vpack.c.bf16 %v3174_v0, %v3174_v0 }
 0x10e   :  { %2166 = vmatprep.mubr.bf16.mxu0 %v310_v16 }
 0x10f   :  { %1973 = vmatpush1.bf16.msra.mxu1 %v2791_v17 }
 0x110   :  { %2137 = vmatpush1.bf16.msra.mxu0 %v2794_v18  ;;  %1974 = vmatprep.subr.bf16.mxu1 %v2799_v43 }
 0x111   :  { %2138 = vmatprep.subr.bf16.mxu0 %v2802_v44 }
 0x113   :  { %1975 = vmatpush1.bf16.msra.mxu1 %v2797_v19 }
 0x114   :  { %2139 = vmatpush1.bf16.msra.mxu0 %v2800_v20  ;;  %1976 = vmatprep.subr.bf16.mxu1 %v2805_v21 }
 0x115   :  { %2140 = vmatprep.subr.bf16.mxu0 %v2808_v22 }
 0x117   :  { %1977 = vmatpush1.bf16.msra.mxu1 %v2803_v23 }
 0x118   :  { %2141 = vmatpush1.bf16.msra.mxu0 %v2806_v55  ;;  %1978 = vmatprep.subr.bf16.mxu1 %v2811_v24 }
 0x119   :  { %2142 = vmatprep.subr.bf16.mxu0 %v2814_v1 }
 0x11b   :  { %1979 = vmatpush1.bf16.msra.mxu1 %v2809_v25 }
 0x11c   :  { %2143 = vmatpush1.bf16.msra.mxu0 %v2812_v52  ;;  %1980 = vmatprep.subr.bf16.mxu1 %v2817_v53 }
 0x11d   :  { %2144 = vmatprep.subr.bf16.mxu0 %v2820_v27 }
 0x11f   :  { %1981 = vmatpush1.bf16.msra.mxu1 %v2815_v56 }
 0x120   :  { %2145 = vmatpush1.bf16.msra.mxu0 %v2818_v42  ;;  %1982 = vmatprep.subr.bf16.mxu1 %v2823_v28 }
 0x121   :  { %2146 = vmatprep.subr.bf16.mxu0 %v2826_v29 }
 0x123   :  { %1983 = vmatpush1.bf16.msra.mxu1 %v2821_v2 }
 0x124   :  { %2147 = vmatpush1.bf16.msra.mxu0 %v2824_v31  ;;  %1984 = vmatprep.subr.bf16.mxu1 %v2829_v32 }
 0x125   :  { %2148 = vmatprep.subr.bf16.mxu0 %v2832_v33 }
 0x127   :  { %1985 = vmatpush1.bf16.msra.mxu1 %v2827_v34 }
 0x128   :  { %2149 = vmatpush1.bf16.msra.mxu0 %v2830_v35  ;;  %1986 = vmatprep.subr.bf16.mxu1 %v2835_v36 }
 0x129   :  { %2150 = vmatprep.subr.bf16.mxu0 %v2838_v37 }
 0x12b   :  { %1987 = vmatpush1.bf16.msra.mxu1 %v2833_v38 }
 0x12c   :  { %2151 = vmatpush1.bf16.msra.mxu0 %v2836_v39  ;;  %1988 = vmatprep.subr.bf16.mxu1 %v2841_v40 }
 0x12d   :  { %2152 = vmatprep.subr.bf16.mxu0 %v2844_v41 }
 0x12f   :  { %1989 = vmatpush1.bf16.msra.mxu1 %v2839_v45 }
 0x130   :  { %2153 = vmatpush1.bf16.msra.mxu0 %v2842_v46  ;;  %1990 = vmatprep.subr.bf16.mxu1 %v2847_v47 }
 0x131   :  { %2154 = vmatprep.subr.bf16.mxu0 %v2850_v48 }
 0x133   :  { %1991 = vmatpush1.bf16.msra.mxu1 %v2845_v49 }
 0x134   :  { %2155 = vmatpush1.bf16.msra.mxu0 %v2848_v50  ;;  %1992 = vmatprep.subr.bf16.mxu1 %v2853_v51 }
 0x135   :  { %2156 = vmatprep.subr.bf16.mxu0 %v2856_v26 }
 0x137   :  { %1993 = vmatpush1.bf16.msra.mxu1 %v2851_v30 }
 0x138   :  { %2157 = vmatpush1.bf16.msra.mxu0 %v2854_v54  ;;  %1994 = vmatprep.subr.bf16.mxu1 %v2859_v57 }
 0x139   :  { %2158 = vmatprep.subr.bf16.mxu0 %v2862_v58 }
 0x13b   :  { %1995 = vmatpush1.bf16.msra.mxu1 %v2857_v59 }
 0x13c   :  { %2159 = vmatpush1.bf16.msra.mxu0 %v2860_v60  ;;  %1996 = vmatprep.subr.bf16.mxu1 %v2865_v61 }
 0x13d   :  { %2160 = vmatprep.subr.bf16.mxu0 %v2868_v62 }
 0x13f   :  { %1997 = vmatpush1.bf16.msra.mxu1 %v2863_v3 }
 0x140   :  { %2161 = vmatpush1.bf16.msra.mxu0 %v2866_v4  ;;  %1998 = vmatprep.subr.bf16.mxu1 %v2871_v5 }
 0x141   :  { %2162 = vmatprep.subr.bf16.mxu0 %v2874_v6 }
 0x143   :  { %1999 = vmatpush1.bf16.msra.mxu1 %v2869_v7 }
 0x144   :  { %2163 = vmatpush1.bf16.msra.mxu0 %v2872_v8  ;;  %2000 = vmatprep.subr.bf16.mxu1 %v2877_v9 }
 0x145   :  { %2164 = vmatprep.subr.bf16.mxu0 %v2880_v10 }
 0x147   :  { %2001 = vmatpush1.bf16.msra.mxu1 %v2875_v11 }
 0x148   :  { %2165 = vmatpush1.bf16.msra.mxu0 %v2878_v12 }
 0x14a   :  { %2003 = vmatmul.mubr.bf16.vlgmr.msra.gmra.mrb[0].mxu1 %v301_v13 }
 0x14b   :  { %2167 = vmatmul.mubr.bf16.vlgmr.msra.gmra.mrb[0].mxu0 %v309_v14 }
 0x21d   :  { %v2004_v15 = vpop.f32.mrb[0].mxu1 }
 0x21e   :  { %v2168_v16 = vpop.f32.mrb[0].mxu0  ;;  %v2006_v18 = vpop.f32.mrb[1].mxu1 }
 0x21f   :  { %v2464_v17 = vadd.f32 %v2168_v16, %v2004_v15  ;;  %v2170_v43 = vpop.f32.mrb[1].mxu0  ;;  %v2008_v19 = vpop.f32.mrb[2].mxu1 }
 0x220   :  { %v2465_v44 = vadd.f32 %v2170_v43, %v2006_v18  ;;  %v2172_v20 = vpop.f32.mrb[2].mxu0  ;;  %v2009_v21 = vpop.f32.mrb[3].mxu1 }
 0x221   :  { %v2173_v22 = vpop.f32.mrb[3].mxu0 }
 0x222   :  { %v2462_v63 = vpack.c.bf16 %v2465_v44, %v2464_v17 }
 0x224   :  { %2463 = vst.sshfl [vmem:[#allocation10] sm:$0x33 pattern:$0x76325410] %v2462_v63 }
 0x225   :  { %2984 = shalt.err (!%p2981_p8)
}
 0x226   :  { %s2985_s13 = scalar_lea.hbm %s3204_s4, 64 }
 0x227   :  { %p2986_p9 = scmp.ne.s32.totalorder %s3204_s4, %s2985_s13  ;;  %p2989_p10 = scmp.lt.u32.totalorder %s2985_s13, %s3204_s4 }
 0x229   :  { %p2991_p11 = pnand %p2989_p10, %p2986_p9 }
 0x22b   :  { %2994 = shalt.err (!%p2991_p11)
}
 0x22c   :  { %2198 = dma.vmem_to_hbm [thread:$0]  %s2196_s10, 64, %s3204_s4, [#allocation4]  }
 0x22d   :  { %3001 = dma.done.wait [#allocation4], 64  }
 0x22e   :  { %3002 = vsyncadd [#allocation4], 4294967232 }
 0x22f   :  { %2202 = vsyncpa [#allocation3], 1 }
 0x230   :  { %2203 = vsyncpa [#allocation6], 1 }
 0x231   :  { %2204 = vsyncpa [#allocation9], 1 }
 0x232   :  { %2205 = vsyncpa [#allocation4], 1 }

</bundles_post_ra>
